<compile_context>
chip_gen: v5e
topology: v5e:2x2
jax: 0.10.0
libtpu: 0.0.40
codegen_flags: <defaults>
</compile_context>

<pallas_src>
import functools
import math

import jax
import jax.numpy as jnp
from jax import lax
from jax.experimental import pallas as pl
from jax.experimental.pallas import tpu as pltpu

_LANE = 128
_SUB = 8
_INV_LN10 = 1.0 / math.log(10.0)


def _round_up(x, m):
    return ((x + m - 1) // m) * m


def _symlog_ln(x_f32, inv_slope):
    """sign(x) * ln(1 + |x| * inv_slope) using sign-bit ops (no compares/selects).

    The log10 scale (1/ln 10) is folded into the wrapper's final scalar multiply."""
    u = lax.bitcast_convert_type(x_f32, jnp.uint32)
    sign = u & jnp.uint32(0x80000000)
    ax = lax.bitcast_convert_type(u & jnp.uint32(0x7FFFFFFF), jnp.float32)
    lg = jnp.log(1.0 + ax * inv_slope)  # >= 0, EUP transcendental
    return lax.bitcast_convert_type(
        lax.bitcast_convert_type(lg, jnp.uint32) | sign, jnp.float32)


def _fold_to_vreg(sq, rt):
    """Fold an (rt, 128) tile to an (8, 128) partial sum (VPU adds only)."""
    if rt % 64 == 0 and rt >= 128:
        # two-level fold: 8 independent chains of depth rt/64, then a depth-8 fold
        t = jnp.sum(sq.reshape(8, rt // 64, _SUB, _LANE), axis=1)
        return jnp.sum(t, axis=0)
    return jnp.sum(sq.reshape(-1, _SUB, _LANE), axis=0)


def _silog_sq_sum_kernel(pred_ref, true_ref, acc_ref, *,
                         inv_slope, rt, steps, n_rows, all_full):
    # acc_ref is a (1, 8, 128) f32 block, resident across the inner (reduction) axis.
    @pl.when(pl.program_id(1) == 0)
    def _():
        acc_ref[...] = jnp.zeros_like(acc_ref)

    p = pred_ref[...].astype(jnp.float32)
    t = true_ref[...].astype(jnp.float32)
    d = _symlog_ln(p, jnp.float32(inv_slope)) - _symlog_ln(t, jnp.float32(inv_slope))
    sq = d * d

    if all_full:
        # every block is completely inside the array: no masking anywhere
        acc_ref[...] += _fold_to_vreg(sq, rt)[None]
    else:
        g = pl.program_id(0) * steps + pl.program_id(1)   # global row-block index
        valid = jnp.int32(n_rows) - g * jnp.int32(rt)     # valid rows in this block

        @pl.when(valid >= rt)                             # full block: hot path
        def _():
            acc_ref[...] += _fold_to_vreg(sq, rt)[None]

        @pl.when(valid < rt)                              # partial / empty tail block
        def _():
            rows = lax.broadcasted_iota(jnp.int32, (rt, _LANE), 0)
            sqm = jnp.where(rows < valid, sq, 0.0)        # select: stale VMEM rows -> 0
            acc_ref[...] += _fold_to_vreg(sqm, rt)[None]


def scale_invariant_loss(pred, true, *, slope=1e-5, row_tile=4096,
                         num_splits=1, core_parallel=False):
    """Pallas TPU implementation of ScaleInvariantLoss.forward(pred, true).

    num_splits=1 for single-TC chips (v5e/v6e); num_splits=2 + core_parallel=True on v7x.
    """
    assert pred.shape == true.shape
    total = int(pred.size)
    inv_slope = 1.0 / float(slope)

    pflat = jnp.ravel(pred)
    tflat = jnp.ravel(true)

    n_rows = total // _LANE            # whole 128-lane rows handled by the kernel
    rem = total - n_rows * _LANE       # <128-element tail handled in plain JAX

    loss_sum = jnp.float32(0.0)        # accumulated in ln-space (scaled at the end)

    if n_rows > 0:
        num_splits = max(1, int(num_splits))
        # rows per grid step: multiple of 8, capped by row_tile and by the data size
        rt = max(_SUB, min(int(row_tile), _round_up(-(-n_rows // num_splits), _SUB)))
        rt = _round_up(rt, _SUB)
        n_blocks = -(-n_rows // rt)
        steps = -(-n_blocks // num_splits)
        all_full = (n_rows % rt == 0) and (n_blocks % num_splits == 0)

        # No jnp.pad: pure slice + reshape (no HBM copy for the common aligned case).
        p2 = pflat[: n_rows * _LANE].reshape(n_rows, _LANE)
        t2 = tflat[: n_rows * _LANE].reshape(n_rows, _LANE)

        kernel = functools.partial(
            _silog_sq_sum_kernel, inv_slope=inv_slope, rt=rt, steps=steps,
            n_rows=n_rows, all_full=all_full)

        def in_idx(c, i):
            # clamp so a (masked-out) trailing block never indexes past the array
            return (jnp.minimum(c * steps + i, n_blocks - 1), 0)

        outer_sem = (pltpu.CORE_PARALLEL if (core_parallel and num_splits > 1)
                     else pltpu.PARALLEL)

        elems = n_rows * _LANE
        cost = pl.CostEstimate(
            flops=14 * elems,
            transcendentals=2 * elems,
            bytes_accessed=elems * (pred.dtype.itemsize + true.dtype.itemsize)
            + num_splits * _SUB * _LANE * 4,
        )

        acc = pl.pallas_call(
            kernel,
            out_shape=jax.ShapeDtypeStruct((num_splits, _SUB, _LANE), jnp.float32),
            grid_spec=pltpu.PrefetchScalarGridSpec(
                num_scalar_prefetch=0,
                grid=(num_splits, steps),
                in_specs=[
                    pl.BlockSpec((rt, _LANE), in_idx),
                    pl.BlockSpec((rt, _LANE), in_idx),
                ],
                # lane-dense resident output block per split (single unmasked writeback)
                out_specs=pl.BlockSpec((1, _SUB, _LANE), lambda c, i: (c, 0, 0)),
            ),
            compiler_params=pltpu.CompilerParams(
                dimension_semantics=(outer_sem, pltpu.ARBITRARY),
            ),
            cost_estimate=cost,
        )(p2, t2)
        loss_sum = loss_sum + jnp.sum(acc)

    if rem > 0:
        # sub-128-element remainder: plain JAX (tiny), same ln-space math
        pt = pflat[n_rows * _LANE:].astype(jnp.float32)
        tt = tflat[n_rows * _LANE:].astype(jnp.float32)
        spt = jnp.sign(pt) * jnp.log(1.0 + jnp.abs(pt) * jnp.float32(inv_slope))
        stt = jnp.sign(tt) * jnp.log(1.0 + jnp.abs(tt) * jnp.float32(inv_slope))
        dt = spt - stt
        loss_sum = loss_sum + jnp.sum(dt * dt)

    # fold the (1/ln 10)^2 log10 scale and the mean into one scalar multiply
    return loss_sum * jnp.float32(_INV_LN10 * _INV_LN10 / total)


def _reference(pred, true, slope=1e-5):
    def symlog(x):
        x = x.astype(jnp.float32)
        return jnp.sign(x) * jnp.log10(1.0 + jnp.abs(x) / jnp.float32(slope))

    d = symlog(pred) - symlog(true)
    return jnp.mean(jnp.square(d))


if __name__ == "__main__":
    key = jax.random.PRNGKey(0)
    k1, k2 = jax.random.split(key)
    # shapes consistent with an error-estimation regression output (NCHW-like)
    pred = jax.random.uniform(k1, (2, 4, 16, 16), jnp.float32, -1.0, 1.0)
    true = jax.random.uniform(k2, (2, 4, 16, 16), jnp.float32, -1.0, 1.0)

    fn = jax.jit(lambda p, t: scale_invariant_loss(p, t))
    out = jax.block_until_ready(fn(pred, true))
    ref = jax.block_until_ready(_reference(pred, true))

    assert jnp.allclose(out, ref, rtol=1e-5, atol=1e-5), (out, ref)
    print("KERNEL_OK")
</pallas_src>

<mosaic_0001>
module attributes {stable_mosaic.version = 11 : i64} {
  func.func @_silog_sq_sum_kernel(%arg0: i32, %arg1: i32, %arg2: memref<16x128xf32, #tpu.memory_space<vmem>>, %arg3: memref<16x128xf32, #tpu.memory_space<vmem>>, %arg4: memref<1x8x128xf32, #tpu.memory_space<vmem>>) attributes {dimension_semantics = [#tpu.dimension_semantics<parallel>, #tpu.dimension_semantics<arbitrary>], iteration_bounds = array<i64: 1, 1>, scalar_prefetch = 0 : i64, scratch_operands = 0 : i64, tpu.core_type = #tpu.core_type<tc>, window_params = [{transform_indices = @transform_0, window_bounds = array<i64: 16, 128>}, {transform_indices = @transform_1, window_bounds = array<i64: 16, 128>}, {transform_indices = @transform_2, window_bounds = array<i64: 1, 8, 128>}]} {
    %c0_i32 = arith.constant 0 : i32
    %0 = arith.cmpi eq, %arg1, %c0_i32 : i32
    %1 = arith.extui %0 : i1 to i32
    %c0_i32_0 = arith.constant 0 : i32
    %2 = arith.cmpi ne, %1, %c0_i32_0 : i32
    scf.if %2 {
      %cst_16 = arith.constant 0.000000e+00 : f32
      %41 = vector.broadcast %cst_16 : f32 to vector<1x8x128xf32>
      %c0_17 = arith.constant 0 : index
      %c0_18 = arith.constant 0 : index
      %c0_19 = arith.constant 0 : index
      %42 = vector.load %arg4[%c0_17, %c0_18, %c0_19] : memref<1x8x128xf32, #tpu.memory_space<vmem>>, vector<1x8x128xf32>
      tpu.vector_store %arg4[%c0_17, %c0_18, %c0_19], %41 {strides = array<i32>} : memref<1x8x128xf32, #tpu.memory_space<vmem>>, vector<1x8x128xf32>,
    } else {
    }
    %c0 = arith.constant 0 : index
    %c0_1 = arith.constant 0 : index
    %3 = vector.load %arg2[%c0, %c0_1] : memref<16x128xf32, #tpu.memory_space<vmem>>, vector<16x128xf32>
    %c0_2 = arith.constant 0 : index
    %c0_3 = arith.constant 0 : index
    %4 = vector.load %arg3[%c0_2, %c0_3] : memref<16x128xf32, #tpu.memory_space<vmem>>, vector<16x128xf32>
    %5 = tpu.bitcast %3 : vector<16x128xf32> -> vector<16x128xi32>
    %c-2147483648_i32 = arith.constant -2147483648 : i32
    %6 = vector.broadcast %c-2147483648_i32 : i32 to vector<16x128xi32>
    %7 = arith.andi %5, %6 : vector<16x128xi32>
    %c2147483647_i32 = arith.constant 2147483647 : i32
    %8 = vector.broadcast %c2147483647_i32 : i32 to vector<16x128xi32>
    %9 = arith.andi %5, %8 : vector<16x128xi32>
    %10 = tpu.bitcast %9 : vector<16x128xi32> -> vector<16x128xf32>
    %cst = arith.constant 1.000000e+05 : f32
    %11 = vector.broadcast %cst : f32 to vector<16x128xf32>
    %12 = arith.mulf %10, %11 : vector<16x128xf32>
    %cst_4 = arith.constant 1.000000e+00 : f32
    %13 = vector.broadcast %cst_4 : f32 to vector<16x128xf32>
    %14 = arith.addf %13, %12 : vector<16x128xf32>
    %15 = math.log %14 : vector<16x128xf32>
    %16 = tpu.bitcast %15 : vector<16x128xf32> -> vector<16x128xi32>
    %17 = arith.ori %16, %7 : vector<16x128xi32>
    %18 = tpu.bitcast %17 : vector<16x128xi32> -> vector<16x128xf32>
    %19 = tpu.bitcast %4 : vector<16x128xf32> -> vector<16x128xi32>
    %c-2147483648_i32_5 = arith.constant -2147483648 : i32
    %20 = vector.broadcast %c-2147483648_i32_5 : i32 to vector<16x128xi32>
    %21 = arith.andi %19, %20 : vector<16x128xi32>
    %c2147483647_i32_6 = arith.constant 2147483647 : i32
    %22 = vector.broadcast %c2147483647_i32_6 : i32 to vector<16x128xi32>
    %23 = arith.andi %19, %22 : vector<16x128xi32>
    %24 = tpu.bitcast %23 : vector<16x128xi32> -> vector<16x128xf32>
    %cst_7 = arith.constant 1.000000e+05 : f32
    %25 = vector.broadcast %cst_7 : f32 to vector<16x128xf32>
    %26 = arith.mulf %24, %25 : vector<16x128xf32>
    %cst_8 = arith.constant 1.000000e+00 : f32
    %27 = vector.broadcast %cst_8 : f32 to vector<16x128xf32>
    %28 = arith.addf %27, %26 : vector<16x128xf32>
    %29 = math.log %28 : vector<16x128xf32>
    %30 = tpu.bitcast %29 : vector<16x128xf32> -> vector<16x128xi32>
    %31 = arith.ori %30, %21 : vector<16x128xi32>
    %32 = tpu.bitcast %31 : vector<16x128xi32> -> vector<16x128xf32>
    %33 = arith.subf %18, %32 : vector<16x128xf32>
    %34 = arith.mulf %33, %33 : vector<16x128xf32>
    %c0_9 = arith.constant 0 : index
    %c0_10 = arith.constant 0 : index
    %c0_11 = arith.constant 0 : index
    %35 = vector.load %arg4[%c0_9, %c0_10, %c0_11] : memref<1x8x128xf32, #tpu.memory_space<vmem>>, vector<1x8x128xf32>
    %36 = vector.shape_cast %34 : vector<16x128xf32> to vector<2x8x128xf32>
    %cst_12 = arith.constant dense<0.000000e+00> : vector<8x128xf32>
    %37 = vector.multi_reduction <add>, %36, %cst_12 [0] : vector<2x8x128xf32> to vector<8x128xf32>
    %38 = vector.shape_cast %37 : vector<8x128xf32> to vector<1x8x128xf32>
    %39 = arith.addf %35, %38 : vector<1x8x128xf32>
    %c0_13 = arith.constant 0 : index
    %c0_14 = arith.constant 0 : index
    %c0_15 = arith.constant 0 : index
    %40 = vector.load %arg4[%c0_13, %c0_14, %c0_15] : memref<1x8x128xf32, #tpu.memory_space<vmem>>, vector<1x8x128xf32>
    tpu.vector_store %arg4[%c0_13, %c0_14, %c0_15], %39 {strides = array<i32>} : memref<1x8x128xf32, #tpu.memory_space<vmem>>, vector<1x8x128xf32>,
    return
  }
  func.func @transform_0(%arg0: i32, %arg1: i32) -> (i32, i32) {
    %c1_i32 = arith.constant 1 : i32
    %0 = arith.muli %arg0, %c1_i32 : i32
    %1 = arith.addi %0, %arg1 : i32
    %c0_i32 = arith.constant 0 : i32
    %2 = arith.minsi %1, %c0_i32 : i32
    %c0_i32_0 = arith.constant 0 : i32
    %c0_i32_1 = arith.constant 0 : i32
    return %2, %c0_i32_0 : i32, i32
  }
  func.func @transform_1(%arg0: i32, %arg1: i32) -> (i32, i32) {
    %c1_i32 = arith.constant 1 : i32
    %0 = arith.muli %arg0, %c1_i32 : i32
    %1 = arith.addi %0, %arg1 : i32
    %c0_i32 = arith.constant 0 : i32
    %2 = arith.minsi %1, %c0_i32 : i32
    %c0_i32_0 = arith.constant 0 : i32
    %c0_i32_1 = arith.constant 0 : i32
    return %2, %c0_i32_0 : i32, i32
  }
  func.func @transform_2(%arg0: i32, %arg1: i32) -> (i32, i32, i32) {
    %c0_i32 = arith.constant 0 : i32
    %c0_i32_0 = arith.constant 0 : i32
    %c0_i32_1 = arith.constant 0 : i32
    return %arg0, %c0_i32, %c0_i32_0 : i32, i32, i32
  }
}

</mosaic_0001>

<bundles_post_ra>
// kernel: _lambda_.1
= control target key start
LH: loop header
LB: loop body
LE: loop exit
PB: predicated region body
PF: predicated region fallthrough
CT: control target
= control target key end

     0   :  { %s191_s0 = inlined_call_operand.vmem [shape: f32[16,128], index: 0, kind: input, shape index: {}]   ;;  %s192_s1 = inlined_call_operand.vmem [shape: f32[16,128], index: 1, kind: input, shape index: {}]   ;;  %s193_s2 = inlined_call_operand.vmem [shape: f32[1,8,128], index: 2, kind: output, shape index: {}]  }
   0x1   :  { %v80_v0 = vld [vmem:[%s191_s0] sm:$0xff]  ;;  %v81_v1 = vld [vmem:[%s191_s0 + $0x8] sm:$0xff] }
   0x2   :  { %v82_v2 = vld [vmem:[%s192_s1] sm:$0xff]  ;;  %v83_v3 = vld [vmem:[%s192_s1 + $0x8] sm:$0xff]  ;;  %v88_v4 = vand.u32 2147483647, %v80_v0  ;;  %v89_v5 = vand.u32 2147483647, %v81_v1 }
   0x3   :  { %v110_v6 = vand.u32 2147483647, %v82_v2  ;;  %v111_v8 = vand.u32 2147483647, %v83_v3  ;;  %v86_v16 = vand.u32 2147483648, %v80_v0  ;;  %v87_v18 = vand.u32 2147483648, %v81_v1 }
   0x4   :  { %v92_v7 = vmul.f32 100000.0, %v88_v4  ;;  %v93_v9 = vmul.f32 100000.0, %v89_v5  ;;  %v108_v21 = vand.u32 2147483648, %v82_v2  ;;  %v109_v24 = vand.u32 2147483648, %v83_v3 }
   0x5   :  { %v114_v10 = vmul.f32 100000.0, %v110_v6  ;;  %v115_v12 = vmul.f32 100000.0, %v111_v8 }
   0x6   :  { %v94_v11 = vadd.f32 1.0, %v92_v7  ;;  %v95_v13 = vadd.f32 1.0, %v93_v9 }
   0x7   :  { %v116_v14 = vadd.f32 1.0, %v114_v10  ;;  %v117_v15 = vadd.f32 1.0, %v115_v12 }
   0x8   :  { %153 = vlog2.f32 %v94_v11 }
   0x9   :  { %155 = vlog2.f32 %v95_v13 }
   0xa   :  { %157 = vlog2.f32 %v116_v14 }
   0xb   :  { %159 = vlog2.f32 %v117_v15 }
   0xe   :  { %v154_v17 = vpop.eup %153 }
   0xf   :  { %v156_v19 = vpop.eup %155  ;;  %v97_v20 = vmul.f32 0.6931472, %v154_v17 }
  0x10   :  { %v158_v22 = vpop.eup %157  ;;  %v99_v23 = vmul.f32 0.6931472, %v156_v19 }
  0x11   :  { %v160_v25 = vpop.eup %159  ;;  %v102_v26 = vor.u32 %v97_v20, %v86_v16  ;;  %v119_v27 = vmul.f32 0.6931472, %v158_v22 }
  0x12   :  { %v103_v28 = vor.u32 %v99_v23, %v87_v18  ;;  %v121_v29 = vmul.f32 0.6931472, %v160_v25 }
  0x13   :  { %v124_v30 = vor.u32 %v119_v27, %v108_v21 }
  0x14   :  { %v125_v31 = vor.u32 %v121_v29, %v109_v24 }
  0x15   :  { %v128_v32 = vsub.f32 %v102_v26, %v124_v30 }
  0x16   :  { %v129_v33 = vsub.f32 %v103_v28, %v125_v31 }
  0x17   :  { %v130_v34 = vmul.f32 %v128_v32, %v128_v32 }
  0x18   :  { %v131_v35 = vmul.f32 %v129_v33, %v129_v33 }
  0x1a   :  { %v133_v36 = vadd.f32 %v131_v35, %v130_v34 }
  0x1c   :  { %135 = vst [vmem:[%s193_s2] sm:$0xff] %v133_v36 }

</bundles_post_ra>
